<compile_context>
chip_gen: v7x
topology: tpu7x:2x2x1
jax: 0.10.0
libtpu: 0.0.40
codegen_flags: <defaults>
</compile_context>

<pallas_src>
import numpy as np

import jax
import jax.numpy as jnp
from jax.experimental import pallas as pl
from jax.experimental.pallas import tpu as pltpu


# ----------------------------------------------------------------------------
# Kernel
# ----------------------------------------------------------------------------
def _make_kernel(*, num_class, gamma, alpha_consts, uniform_alpha,
                 num_j, needs_mask, row_tiled, valid_last):
    """Build the focal-loss kernel body.

    Block layout inside the kernel:
      x_ref : (1, C, TR, L)   logits (class on the leading, non-tiled axis)
      t_ref : (1, 1, TR, L)   int32 targets
      out   : (1, OUT_ROWS, L) per-batch lane partials (row0 focal, row1 alpha)
      facc  : (TR, L) f32 scratch (per-position focal partial sums)
      aacc  : (TR, L) f32 scratch (only when alpha is non-uniform)
    """
    int_gamma = float(gamma) == int(gamma) and gamma >= 0

    def body(x_ref, t_ref, out_ref, facc_ref, aacc_ref):
        j = pl.program_id(1)

        @pl.when(j == 0)
        def _init():                                   # per-batch reset
            facc_ref[...] = jnp.zeros_like(facc_ref)
            if not uniform_alpha:
                aacc_ref[...] = jnp.zeros_like(aacc_ref)

        t = t_ref[0, 0]                                # (TR, L) int32
        xs = [x_ref[0, c].astype(jnp.float32) for c in range(num_class)]

        # Class-axis max: C-1 elementwise VPU maxes (no XLU).
        m = xs[0]
        for c in range(1, num_class):
            m = jnp.maximum(m, xs[c])

        # Class-axis exp/sum + target gather via boolean selects (no one-hot).
        e0 = jnp.exp(xs[0] - m)
        s = e0
        sel = t == 0
        e_t = jnp.where(sel, e0, 0.0)
        a_g = None
        if not uniform_alpha:
            a_g = jnp.where(sel, alpha_consts[0], 0.0)
        for c in range(1, num_class):
            ec = jnp.exp(xs[c] - m)
            s = s + ec
            sel = t == c
            e_t = jnp.where(sel, ec, e_t)
            if not uniform_alpha:
                a_g = jnp.where(sel, alpha_consts[c], a_g)

        # pt = e_target / sum(e) (+eps): EUP reciprocal + one Newton step.
        inv_s = pl.reciprocal(s, approx=True)
        inv_s = inv_s * (2.0 - s * inv_s)
        pt = e_t * inv_s + 1e-10
        logpt = jnp.log(pt)

        # (1 - pt)^gamma: clamp (pt can be 1+eps); repeated mul for int gamma.
        omp = jnp.maximum(1.0 - pt, 0.0)
        if int_gamma:
            w = jnp.ones_like(omp)
            for _ in range(int(gamma)):
                w = w * omp
        else:
            w = jnp.power(omp, gamma)
        focal = -(w * logpt)                           # (TR, L)

        def _accumulate(f_val, a_val):
            facc_ref[...] += f_val
            if not uniform_alpha:
                aacc_ref[...] += a_val

        if needs_mask:
            # Only the final spatial tile is partial; all other steps take the
            # unmasked path so steady-state does zero masking work.
            @pl.when(j < num_j - 1)
            def _acc_full():
                _accumulate(focal, a_g)

            @pl.when(j == num_j - 1)
            def _acc_masked():
                axis = 0 if row_tiled else 1
                idx = jax.lax.broadcasted_iota(jnp.int32, focal.shape, axis)
                valid = idx < valid_last
                _accumulate(jnp.where(valid, focal, 0.0),
                            None if uniform_alpha else jnp.where(valid, a_g, 0.0))
        else:
            _accumulate(focal, a_g)

        @pl.when(j == num_j - 1)
        def _finalize():
            # One per-batch cross-sublane reduce; lane reduce deferred to wrapper.
            out_ref[0, 0:1, :] = jnp.sum(facc_ref[...], axis=0, keepdims=True)
            if not uniform_alpha:
                out_ref[0, 1:2, :] = jnp.sum(aacc_ref[...], axis=0, keepdims=True)

    if uniform_alpha:
        def kernel(x_ref, t_ref, out_ref, facc_ref):
            body(x_ref, t_ref, out_ref, facc_ref, None)
    else:
        def kernel(x_ref, t_ref, out_ref, facc_ref, aacc_ref):
            body(x_ref, t_ref, out_ref, facc_ref, aacc_ref)
    return kernel


# ----------------------------------------------------------------------------
# Tiling / generation-aware budgets
# ----------------------------------------------------------------------------
def _physical_vmem_bytes():
    try:
        info = pltpu.get_tpu_info()
        v = getattr(info, "vmem_capacity_bytes", None)
        if v:
            return int(v)
    except Exception:
        pass
    return 64 * 1024 * 1024          # conservative (v7x-sized) default


def _choose_tiling(HW, C, dtype_bytes, uniform_alpha):
    phys = _physical_vmem_bytes()
    big_vmem = phys >= 96 * 1024 * 1024          # 128-MiB parts (v5e/v6e) vs v7x
    vmem_limit = (64 if big_vmem else 32) * 1024 * 1024
    target_pos = 32768 if big_vmem else 16384

    # Per-spatial-position VMEM estimate: double-buffered x/t blocks, in-flight
    # f32 temporaries (~C class planes + a handful of running values), scratch.
    n_acc = 1 if uniform_alpha else 2
    bytes_per_pos = 2 * C * dtype_bytes + 2 * 4 + (C + 8) * 4 + n_acc * 4
    cap_pos = max(1024, min(target_pos, (vmem_limit // 2) // bytes_per_pos))

    if HW % 128 == 0:
        # 4-D layout: spatial on (sublanes=rows, lanes=128), class leading.
        R = HW // 128
        cap_rows = max(1, cap_pos // 128)
        if R <= cap_rows:
            tr, nj = R, 1
        else:
            cap_rows = max(8, (cap_rows // 8) * 8)
            tr = 0
            for cand in range(cap_rows, 7, -8):   # prefer tiles that divide R
                if R % cand == 0:
                    tr = cand
                    break
            if tr == 0:
                tr = cap_rows                     # last tile partial -> masked
            nj = -(-R // tr)
        valid_last = R - (nj - 1) * tr
        return dict(row_tiled=True, R=R, tr=tr, lanes=128, nj=nj,
                    valid_last=valid_last, needs_mask=(nj * tr != R),
                    vmem_limit=vmem_limit)

    # Fallback: HW not a multiple of 128 -> spatial on lanes only.
    if HW <= cap_pos:
        tl, nj = HW, 1
    else:
        cap_l = max(128, (cap_pos // 128) * 128)
        tl = 0
        for cand in range(cap_l, 127, -128):
            if HW % cand == 0:
                tl = cand
                break
        if tl == 0:
            tl = cap_l
        nj = -(-HW // tl)
    valid_last = HW - (nj - 1) * tl
    return dict(row_tiled=False, R=1, tr=1, lanes=tl, nj=nj,
                valid_last=valid_last, needs_mask=(nj * tl != HW),
                vmem_limit=vmem_limit)


# ----------------------------------------------------------------------------
# Wrapper
# ----------------------------------------------------------------------------
def multi_focal_loss(x_nchw, target, alpha, gamma=2.0, size_average=True):
    """Forward pass of MultiFocalLoss (smooth=None path) on TPU via Pallas.

    `x_nchw` may be f32 or bf16; bf16 logits are upcast inside the kernel
    (keep them bf16 in HBM on bandwidth-limited v5e/v6e — no wrapper cast).
    """
    N, C, H, W = x_nchw.shape
    HW = H * W
    M = N * HW

    # alpha is an __init__-time constant in the reference module: fold it in.
    try:
        alpha_np = np.asarray(alpha, dtype=np.float32).reshape(-1)
    except Exception as e:
        raise TypeError("alpha must be a concrete per-class vector") from e
    if alpha_np.shape[0] != C:
        raise ValueError("alpha must have num_class entries")
    uniform_alpha = bool(np.all(alpha_np == alpha_np[0]))
    alpha_consts = tuple(float(a) for a in alpha_np)

    dtype_bytes = jnp.dtype(x_nchw.dtype).itemsize
    cfg = _choose_tiling(HW, C, dtype_bytes, uniform_alpha)
    row_tiled, R, tr = cfg["row_tiled"], cfg["R"], cfg["tr"]
    lanes, nj = cfg["lanes"], cfg["nj"]

    # Pure reshapes only — no transpose / pad / dtype cast in HBM.
    if row_tiled:
        x4d = x_nchw.reshape(N, C, R, 128)
        t4d = target.reshape(N, 1, R, 128).astype(jnp.int32)
        x_block, t_block = (1, C, tr, 128), (1, 1, tr, 128)
        x_map = lambda b, j: (b, 0, j, 0)
    else:
        x4d = x_nchw.reshape(N, C, 1, HW)
        t4d = target.reshape(N, 1, 1, HW).astype(jnp.int32)
        x_block, t_block = (1, C, 1, lanes), (1, 1, 1, lanes)
        x_map = lambda b, j: (b, 0, 0, j)

    out_rows = 1 if uniform_alpha else 2
    kernel = _make_kernel(num_class=C, gamma=float(gamma),
                          alpha_consts=alpha_consts, uniform_alpha=uniform_alpha,
                          num_j=nj, needs_mask=cfg["needs_mask"],
                          row_tiled=row_tiled, valid_last=cfg["valid_last"])

    scratch = [pltpu.VMEM((tr, lanes), jnp.float32)]        # focal partials
    if not uniform_alpha:
        scratch.append(pltpu.VMEM((tr, lanes), jnp.float32))  # alpha partials

    out = pl.pallas_call(
        kernel,
        out_shape=jax.ShapeDtypeStruct((N, out_rows, lanes), jnp.float32),
        grid_spec=pltpu.PrefetchScalarGridSpec(
            num_scalar_prefetch=0,
            grid=(N, nj),
            in_specs=[pl.BlockSpec(x_block, x_map),
                      pl.BlockSpec(t_block, x_map)],
            out_specs=pl.BlockSpec((1, out_rows, lanes), lambda b, j: (b, 0, 0)),
            scratch_shapes=scratch,
        ),
        compiler_params=pltpu.CompilerParams(
            # Batch axis "parallel": per-batch scratch init/finalize and
            # per-batch output blocks make it safe to shard across v7x's two
            # TensorCores; no effect on single-TC v5e/v6e.
            dimension_semantics=("parallel", "arbitrary"),
            vmem_limit_bytes=cfg["vmem_limit"],
        ),
    )(x4d, t4d)

    fsum = jnp.sum(out[:, 0, :])
    if uniform_alpha:
        asum = alpha_consts[0] * M          # alpha=None default: analytic sum
    else:
        asum = jnp.sum(out[:, 1, :])

    # Reproduce the PyTorch broadcasting: loss is the (M,1,M) outer product of
    # alpha[target_i] and the focal term, so mean=(asum/M)*(fsum/M), sum=asum*fsum.
    if size_average:
        return (asum / M) * (fsum / M)
    return asum * fsum


# ----------------------------------------------------------------------------
# Pure-JAX replica of the PyTorch forward (including its broadcasting)
# ----------------------------------------------------------------------------
def _reference_loss(x_nchw, target, alpha, gamma=2.0, size_average=True):
    N, C, H, W = x_nchw.shape
    logit = jax.nn.softmax(x_nchw.astype(jnp.float32), axis=1)
    logit = jnp.transpose(logit.reshape(N, C, -1), (0, 2, 1)).reshape(-1, C)
    tgt = target.reshape(-1, 1).astype(jnp.int32)
    one_hot = (jnp.arange(C)[None, :] == tgt).astype(jnp.float32)
    pt = jnp.sum(one_hot * logit, axis=1) + 1e-10             # (M,)
    logpt = jnp.log(pt)
    alpha_g = jnp.asarray(alpha, jnp.float32).reshape(C, 1)[tgt]   # (M,1,1)
    loss = -1.0 * alpha_g * jnp.power(1.0 - pt, gamma) * logpt     # (M,1,M)
    return jnp.mean(loss) if size_average else jnp.sum(loss)


if __name__ == "__main__":
    num_class = 4
    N, H, W = 2, 16, 16
    key = jax.random.PRNGKey(0)
    kx, kt = jax.random.split(key)
    x = jax.random.normal(kx, (N, num_class, H, W), dtype=jnp.float32)
    target = jax.random.randint(kt, (N, H, W), 0, num_class, dtype=jnp.int32)
    gamma = 2.0

    # Path 1: module default alpha=None -> torch.ones(num_class, 1) (uniform fast path).
    alpha_u = jnp.ones((num_class, 1), dtype=jnp.float32)
    loss_u = jax.block_until_ready(
        multi_focal_loss(x, target, alpha_u, gamma=gamma, size_average=True))
    ref_u = _reference_loss(x, target, alpha_u, gamma=gamma, size_average=True)
    assert jnp.allclose(loss_u, ref_u, rtol=1e-4, atol=1e-6), (loss_u, ref_u)

    # Path 2: list alpha (normalized, as in the PyTorch __init__) -> gather path.
    alpha_list = np.array([1.0, 2.0, 3.0, 4.0], dtype=np.float32)
    alpha_n = alpha_list / alpha_list.sum()
    loss_n = jax.block_until_ready(
        multi_focal_loss(x, target, alpha_n, gamma=gamma, size_average=True))
    ref_n = _reference_loss(x, target, alpha_n, gamma=gamma, size_average=True)
    assert jnp.allclose(loss_n, ref_n, rtol=1e-4, atol=1e-6), (loss_n, ref_n)

    print("KERNEL_OK")
</pallas_src>

<mosaic_0001>
module attributes {stable_mosaic.version = 11 : i64} {
  func.func @kernel(%arg0: i32, %arg1: i32, %arg2: memref<1x4x2x128xf32, #tpu.memory_space<vmem>>, %arg3: memref<1x1x2x128xi32, #tpu.memory_space<vmem>>, %arg4: memref<1x1x128xf32, #tpu.memory_space<vmem>>, %arg5: memref<2x128xf32, #tpu.memory_space<vmem>>) attributes {dimension_semantics = [#tpu.dimension_semantics<parallel>, #tpu.dimension_semantics<arbitrary>], iteration_bounds = array<i64: 2, 1>, scalar_prefetch = 0 : i64, scratch_operands = 1 : i64, tpu.core_type = #tpu.core_type<tc>, window_params = [{transform_indices = @transform_0, window_bounds = array<i64: 1, 4, 2, 128>}, {transform_indices = @transform_1, window_bounds = array<i64: 1, 1, 2, 128>}, {transform_indices = @transform_2, window_bounds = array<i64: 1, 1, 128>}]} {
    %c0_i32 = arith.constant 0 : i32
    %0 = arith.cmpi eq, %arg1, %c0_i32 : i32
    %1 = arith.extui %0 : i1 to i32
    %c0_i32_0 = arith.constant 0 : i32
    %2 = arith.cmpi ne, %1, %c0_i32_0 : i32
    scf.if %2 {
      %cst_30 = arith.constant 0.000000e+00 : f32
      %65 = vector.broadcast %cst_30 : f32 to vector<2x128xf32>
      %c0_31 = arith.constant 0 : index
      %c0_32 = arith.constant 0 : index
      %66 = vector.load %arg5[%c0_31, %c0_32] : memref<2x128xf32, #tpu.memory_space<vmem>>, vector<2x128xf32>
      tpu.vector_store %arg5[%c0_31, %c0_32], %65 {strides = array<i32>} : memref<2x128xf32, #tpu.memory_space<vmem>>, vector<2x128xf32>,
    } else {
    }
    %c0 = arith.constant 0 : index
    %c0_1 = arith.constant 0 : index
    %c0_2 = arith.constant 0 : index
    %c0_3 = arith.constant 0 : index
    %3 = vector.load %arg3[%c0, %c0_1, %c0_2, %c0_3] : memref<1x1x2x128xi32, #tpu.memory_space<vmem>>, vector<1x1x2x128xi32>
    %4 = vector.shape_cast %3 : vector<1x1x2x128xi32> to vector<2x128xi32>
    %c0_4 = arith.constant 0 : index
    %c0_5 = arith.constant 0 : index
    %c0_6 = arith.constant 0 : index
    %c0_7 = arith.constant 0 : index
    %5 = vector.load %arg2[%c0_4, %c0_5, %c0_6, %c0_7] : memref<1x4x2x128xf32, #tpu.memory_space<vmem>>, vector<1x1x2x128xf32>
    %6 = vector.shape_cast %5 : vector<1x1x2x128xf32> to vector<2x128xf32>
    %c0_8 = arith.constant 0 : index
    %c1 = arith.constant 1 : index
    %c0_9 = arith.constant 0 : index
    %c0_10 = arith.constant 0 : index
    %7 = vector.load %arg2[%c0_8, %c1, %c0_9, %c0_10] : memref<1x4x2x128xf32, #tpu.memory_space<vmem>>, vector<1x1x2x128xf32>
    %8 = vector.shape_cast %7 : vector<1x1x2x128xf32> to vector<2x128xf32>
    %c0_11 = arith.constant 0 : index
    %c2 = arith.constant 2 : index
    %c0_12 = arith.constant 0 : index
    %c0_13 = arith.constant 0 : index
    %9 = vector.load %arg2[%c0_11, %c2, %c0_12, %c0_13] : memref<1x4x2x128xf32, #tpu.memory_space<vmem>>, vector<1x1x2x128xf32>
    %10 = vector.shape_cast %9 : vector<1x1x2x128xf32> to vector<2x128xf32>
    %c0_14 = arith.constant 0 : index
    %c3 = arith.constant 3 : index
    %c0_15 = arith.constant 0 : index
    %c0_16 = arith.constant 0 : index
    %11 = vector.load %arg2[%c0_14, %c3, %c0_15, %c0_16] : memref<1x4x2x128xf32, #tpu.memory_space<vmem>>, vector<1x1x2x128xf32>
    %12 = vector.shape_cast %11 : vector<1x1x2x128xf32> to vector<2x128xf32>
    %13 = arith.maximumf %6, %8 : vector<2x128xf32>
    %14 = arith.maximumf %13, %10 : vector<2x128xf32>
    %15 = arith.maximumf %14, %12 : vector<2x128xf32>
    %16 = arith.subf %6, %15 : vector<2x128xf32>
    %17 = math.exp %16 : vector<2x128xf32>
    %c0_i32_17 = arith.constant 0 : i32
    %18 = vector.broadcast %c0_i32_17 : i32 to vector<2x128xi32>
    %19 = arith.cmpi eq, %4, %18 : vector<2x128xi32>
    %cst = arith.constant 0.000000e+00 : f32
    %20 = vector.broadcast %cst : f32 to vector<2x128xf32>
    %21 = arith.select %19, %17, %20 : vector<2x128xi1>, vector<2x128xf32>
    %22 = arith.subf %8, %15 : vector<2x128xf32>
    %23 = math.exp %22 : vector<2x128xf32>
    %24 = arith.addf %17, %23 : vector<2x128xf32>
    %c1_i32 = arith.constant 1 : i32
    %25 = vector.broadcast %c1_i32 : i32 to vector<2x128xi32>
    %26 = arith.cmpi eq, %4, %25 : vector<2x128xi32>
    %27 = arith.select %26, %23, %21 : vector<2x128xi1>, vector<2x128xf32>
    %28 = arith.subf %10, %15 : vector<2x128xf32>
    %29 = math.exp %28 : vector<2x128xf32>
    %30 = arith.addf %24, %29 : vector<2x128xf32>
    %c2_i32 = arith.constant 2 : i32
    %31 = vector.broadcast %c2_i32 : i32 to vector<2x128xi32>
    %32 = arith.cmpi eq, %4, %31 : vector<2x128xi32>
    %33 = arith.select %32, %29, %27 : vector<2x128xi1>, vector<2x128xf32>
    %34 = arith.subf %12, %15 : vector<2x128xf32>
    %35 = math.exp %34 : vector<2x128xf32>
    %36 = arith.addf %30, %35 : vector<2x128xf32>
    %c3_i32 = arith.constant 3 : i32
    %37 = vector.broadcast %c3_i32 : i32 to vector<2x128xi32>
    %38 = arith.cmpi eq, %4, %37 : vector<2x128xi32>
    %39 = arith.select %38, %35, %33 : vector<2x128xi1>, vector<2x128xf32>
    %40 = tpu.reciprocal %36 {approx = true} : vector<2x128xf32> -> vector<2x128xf32>
    %41 = arith.mulf %36, %40 : vector<2x128xf32>
    %cst_18 = arith.constant 2.000000e+00 : f32
    %42 = vector.broadcast %cst_18 : f32 to vector<2x128xf32>
    %43 = arith.subf %42, %41 : vector<2x128xf32>
    %44 = arith.mulf %40, %43 : vector<2x128xf32>
    %45 = arith.mulf %39, %44 : vector<2x128xf32>
    %cst_19 = arith.constant 1.000000e-10 : f32
    %46 = vector.broadcast %cst_19 : f32 to vector<2x128xf32>
    %47 = arith.addf %45, %46 : vector<2x128xf32>
    %48 = math.log %47 : vector<2x128xf32>
    %cst_20 = arith.constant 1.000000e+00 : f32
    %49 = vector.broadcast %cst_20 : f32 to vector<2x128xf32>
    %50 = arith.subf %49, %47 : vector<2x128xf32>
    %cst_21 = arith.constant 0.000000e+00 : f32
    %51 = vector.broadcast %cst_21 : f32 to vector<2x128xf32>
    %52 = arith.maximumf %50, %51 : vector<2x128xf32>
    %cst_22 = arith.constant 1.000000e+00 : f32
    %53 = vector.broadcast %cst_22 : f32 to vector<2x128xf32>
    %54 = arith.mulf %53, %52 : vector<2x128xf32>
    %55 = arith.mulf %54, %52 : vector<2x128xf32>
    %56 = arith.mulf %55, %48 : vector<2x128xf32>
    %cst_23 = arith.constant 0.000000e+00 : f32
    %57 = vector.broadcast %cst_23 : f32 to vector<2x128xf32>
    %58 = arith.subf %57, %56 : vector<2x128xf32>
    %c0_24 = arith.constant 0 : index
    %c0_25 = arith.constant 0 : index
    %59 = vector.load %arg5[%c0_24, %c0_25] : memref<2x128xf32, #tpu.memory_space<vmem>>, vector<2x128xf32>
    %60 = arith.addf %59, %58 : vector<2x128xf32>
    %c0_26 = arith.constant 0 : index
    %c0_27 = arith.constant 0 : index
    %61 = vector.load %arg5[%c0_26, %c0_27] : memref<2x128xf32, #tpu.memory_space<vmem>>, vector<2x128xf32>
    tpu.vector_store %arg5[%c0_26, %c0_27], %60 {strides = array<i32>} : memref<2x128xf32, #tpu.memory_space<vmem>>, vector<2x128xf32>,
    %c0_i32_28 = arith.constant 0 : i32
    %62 = arith.cmpi eq, %arg1, %c0_i32_28 : i32
    %63 = arith.extui %62 : i1 to i32
    %c0_i32_29 = arith.constant 0 : i32
    %64 = arith.cmpi ne, %63, %c0_i32_29 : i32
    scf.if %64 {
      %c0_30 = arith.constant 0 : index
      %c0_31 = arith.constant 0 : index
      %65 = vector.load %arg5[%c0_30, %c0_31] : memref<2x128xf32, #tpu.memory_space<vmem>>, vector<2x128xf32>
      %cst_32 = arith.constant dense<0.000000e+00> : vector<128xf32>
      %66 = vector.multi_reduction <add>, %65, %cst_32 [0] : vector<2x128xf32> to vector<128xf32>
      %67 = vector.shape_cast %66 : vector<128xf32> to vector<1x128xf32>
      %c0_33 = arith.constant 0 : index
      %c0_34 = arith.constant 0 : index
      %c0_35 = arith.constant 0 : index
      %68 = vector.load %arg4[%c0_33, %c0_34, %c0_35] : memref<1x1x128xf32, #tpu.memory_space<vmem>>, vector<1x1x128xf32>
      %69 = vector.shape_cast %68 : vector<1x1x128xf32> to vector<1x128xf32>
      %70 = vector.shape_cast %67 : vector<1x128xf32> to vector<1x1x128xf32>
      tpu.vector_store %arg4[%c0_33, %c0_34, %c0_35], %70 {strides = array<i32>} : memref<1x1x128xf32, #tpu.memory_space<vmem>>, vector<1x1x128xf32>,
    } else {
    }
    return
  }
  func.func @transform_0(%arg0: i32, %arg1: i32) -> (i32, i32, i32, i32) {
    %c0_i32 = arith.constant 0 : i32
    %c0_i32_0 = arith.constant 0 : i32
    %c0_i32_1 = arith.constant 0 : i32
    return %arg0, %c0_i32, %arg1, %c0_i32_0 : i32, i32, i32, i32
  }
  func.func @transform_1(%arg0: i32, %arg1: i32) -> (i32, i32, i32, i32) {
    %c0_i32 = arith.constant 0 : i32
    %c0_i32_0 = arith.constant 0 : i32
    %c0_i32_1 = arith.constant 0 : i32
    return %arg0, %c0_i32, %arg1, %c0_i32_0 : i32, i32, i32, i32
  }
  func.func @transform_2(%arg0: i32, %arg1: i32) -> (i32, i32, i32) {
    %c0_i32 = arith.constant 0 : i32
    %c0_i32_0 = arith.constant 0 : i32
    %c0_i32_1 = arith.constant 0 : i32
    return %arg0, %c0_i32, %c0_i32_0 : i32, i32, i32
  }
}

</mosaic_0001>

<bundles_post_ra>
// kernel: tpu_custom_call.1
= control target key start
LH: loop header
LB: loop body
LE: loop exit
PB: predicated region body
PF: predicated region fallthrough
CT: control target
= control target key end

     0   :  { %7 = vsyncpa [#allocation4], 0  ;;  %s886_s0 = inlined_call_operand.hbm [shape: f32[2,4,2,128], index: 0, kind: input, shape index: {}]   ;;  %s887_s1 = inlined_call_operand.hbm [shape: s32[2,1,2,128], index: 1, kind: input, shape index: {}]   ;;  %s888_s2 = inlined_call_operand.hbm [shape: f32[2,1,128], index: 2, kind: output, shape index: {}]  }
   0x1   :  { %9 = vsyncpa [#allocation4 + $0x1], 0 }
   0x2   :  { %10 = vsyncpa [#allocation7], 0 }
   0x3   :  { %12 = vsyncpa [#allocation7 + $0x1], 0 }
   0x4   :  { %13 = vsyncpa [#allocation5], 0 }
   0x5   :  { %15 = vsyncpa [#allocation5 + $0x1], 0  ;;  %s667_s9 = smov 0   ;;  %s669_s10 = smov 0  }
   0x6   :  { %s671_s11 = smov 0   ;;  %s673_s12 = smov 0  }
   0x7   :  { %s675_s13 = smov 0   ;;  %s677_s14 = smov 0  }
   0x8 LB: > { %s397_s15 = sadd.s32 4294967295, %s644_s14   ;;  %s398_s16 = sadd.s32 4294967294, %s644_s14   ;;  %s644_s14 = sphi %s677_s14, %s21_s14   ;;  %s640_s13 = sphi %s675_s13, %s907_s13   ;;  %s636_s12 = sphi %s673_s12, %s906_s12   ;;  %s632_s11 = sphi %s671_s11, %s905_s11   ;;  %s628_s10 = sphi %s669_s10, %s904_s10   ;;  %s624_s9 = sphi %s667_s9, %s903_s9  }
   0x9   : > { %s33_s17 = sadd.s32 1, %s640_s13  ;;  %s42_s18 = sadd.s32 1, %s632_s11 }
   0xa   : > { %p35_p0 = scmp.ge.s32.totalorder %s33_s17, 2  ;;  %p49_p1 = scmp.ne.s32.totalorder %s632_s11, %s628_s10 }
   0xb   : > { %p50_p2 = scmp.eq.s32.totalorder %s644_s14, 0  ;;  %p55_p3 = scmp.ne.s32.totalorder %s628_s10, %s624_s9 }
   0xc   : > { %s909_s17 = smov (%p35_p0, %s33_s17), 0  ;;  %p56_p5 = scmp.eq.s32.totalorder %s397_s15, 0 }
   0xd   : > { %p708_p4 = por %p50_p2, %p49_p1  ;;  %s37_s20 = ssub.s32 %s640_s13, %s909_s17 }
   0xe   : > { %p107_p6 = scmp.eq.s32.totalorder %s397_s15, 1  ;;  %p40_p7 = scmp.eq.s32.totalorder %s37_s20, 0 }
   0xf   : > { %p714_p8 = por %p56_p5, %p55_p3  ;;  %p113_p10 = scmp.eq.s32.totalorder %s398_s16, 1 }
  0x10   : > { %p718_p9 = por %p107_p6, %p49_p1  ;;  %p433_p13 = scmp.lt.s32.totalorder %s644_s14, 2 }
  0x11   : > { %s892_s21 = scalar_select %p714_p8, 1, 0 }
  0x12   : > { %s893_s22 = scalar_select %p718_p9, 1, 0 }
  0x13   : > { %s723_s23 = scalar_select %p40_p7, %s632_s11, %s42_s18  }
  0x14   : > { %p725_p11 = por %p113_p10, %p55_p3  ;;  %s732_s25 = sand.u32 1, %s632_s11  }
  0x15   : > { %s401_s26 = sshll.u32 %s732_s25, 3  ;;  %s415_s27 = sshll.u32 %s640_s13, 7 }
  0x16   : > { %s894_s24 = scalar_select %p725_p11, 1, 0 }
  0x17   : > { %s739_s30 = scalar_lea.hbm %s886_s0, %s415_s27  ;;  %s137_s3 = scalar_lea.vmem [#allocation3], %s401_s26 }
  0x18   : > { %s145_s4 = sshll.u32 %s137_s3, 4  ;;  %p745_p0 = pnand %p433_p13, %p708_p4  ;;  %s741_s4 = int_to_ptr.vmem [resolvable:$true] %s145_s4 }
  0x19   : > { %s134_s6 = scalar_lea.sflag [#allocation4], %s732_s25  ;;  %s498_s7 = scalar_lea.hbm %s739_s30, 128 }
  0x1a   : > { %p499_p2 = scmp.ne.s32.totalorder %s739_s30, %s498_s7  ;;  %p500_p3 = pneg %p745_p0 }
  0x1b   : > { %s503_s16 = scalar_lea.hbm %s886_s0, 256  ;;  %p504_p4 = scmp.lt.u32.totalorder %s739_s30, %s886_s0 }
  0x1c   : > { %p501_p5 = pnand %p500_p3, %p499_p2  ;;  %p505_p7 = scmp.lt.u32.totalorder %s503_s16, %s498_s7 }
  0x1d   : > { %p507_p13 = scmp.lt.u32.totalorder %s498_s7, %s739_s30 }
  0x1e   : > { %p502_p6 = pneg %p501_p5  ;;  %p506_p10 = por %p505_p7, %p504_p4 }
  0x20   : > { %p508_p12 = por %p507_p13, %p506_p10 }
  0x22   : > { %p509_p1 = pnand %p508_p12, %p502_p6 }
  0x24   : > { %512 = shalt.err (!%p509_p1)
}
  0x25   : > { %s513_s20 = scalar_lea.vmem %s741_s4, 128  ;;  %s646_s26 = smov [#allocation3]  }
  0x26   : > { %p514_p2 = scmp.ne.s32.totalorder %s741_s4, %s513_s20  ;;  %s518_s27 = sshll.u32 %s646_s26, 4  ;;  %s519_s27 = int_to_ptr.vmem [resolvable:$false] %s518_s27 }
  0x27   : > { %s520_s28 = scalar_lea.vmem %s519_s27, 256  ;;  %p521_p9 = scmp.lt.s32.totalorder %s741_s4, %s519_s27 }
  0x28   : > { %p516_p5 = pnand %p514_p2, %p500_p3  ;;  %p522_p4 = scmp.lt.s32.totalorder %s520_s28, %s513_s20 }
  0x2a   : > { %p517_p11 = pneg %p516_p5  ;;  %p523_p7 = por %p522_p4, %p521_p9 }
  0x2c   : > { %p524_p10 = pnand %p523_p7, %p517_p11 }
  0x2e   : > { %527 = shalt.err (!%p524_p10)
}
  0x2f   : > { %s647_s29 = smov 32   ;;  %s648_s3 = smov 2  }
  0x30   : > { %425 = dma.hbm_to_vmem [thread:$0]  (!%p745_p0), %s739_s30, 128, %s741_s4, %s134_s6, %s647_s29, %s647_s29, %s648_s3  }
  0x31   : > { %p172_p12 = scmp.lt.s32.totalorder %s644_s14, 3  ;;  %s404_s7 = sshll.u32 %s732_s25, 1 }
  0x32   : > { %s405_s8 = sshll.u32 %s640_s13, 5  ;;  %p896_p9 = scmp.ge.s32.totalorder %s644_s14, 1 }
  0x33   : > { %s790_s19 = scalar_lea.hbm %s887_s1, %s405_s8  ;;  %s159_s20 = scalar_lea.vmem [#allocation6], %s404_s7 }
  0x34   : > { %p783_p11 = pnand %p896_p9, %p172_p12  ;;  %s167_s26 = sshll.u32 %s159_s20, 4  ;;  %s168_s26 = int_to_ptr.vmem [resolvable:$true] %s167_s26 }
  0x35   : > { %s156_s30 = scalar_lea.sflag [#allocation7], %s732_s25  ;;  %s528_s4 = scalar_lea.hbm %s790_s19, 32 }
  0x36   : > { %s897_s15 = scalar_select %p783_p11, 1, 0 }
  0x37   : > { %p529_p1 = scmp.ne.s32.totalorder %s790_s19, %s528_s4  ;;  %s533_s28 = scalar_lea.hbm %s887_s1, 64 }
  0x38   : > { %p534_p2 = scmp.lt.u32.totalorder %s790_s19, %s887_s1  ;;  %p535_p5 = scmp.lt.u32.totalorder %s533_s28, %s528_s4 }
  0x39   : > { %p531_p6 = pnand %p529_p1, %p500_p3  ;;  %p537_p7 = scmp.lt.u32.totalorder %s528_s4, %s790_s19 }
  0x3a   : > { %p536_p4 = por %p535_p5, %p534_p2 }
  0x3b   : > { %p532_p13 = pneg %p531_p6 }
  0x3c   : > { %p538_p10 = por %p537_p7, %p536_p4 }
  0x3e   : > { %p539_p12 = pnand %p538_p10, %p532_p13 }
  0x40   : > { %542 = shalt.err (!%p539_p12)
}
  0x41   : > { %s543_s25 = scalar_lea.vmem %s168_s26, 32  ;;  %s649_s7 = smov [#allocation6]  }
  0x42   : > { %p544_p9 = scmp.ne.s32.totalorder %s168_s26, %s543_s25  ;;  %s548_s8 = sshll.u32 %s649_s7, 4  ;;  %s549_s8 = int_to_ptr.vmem [resolvable:$false] %s548_s8 }
  0x43   : > { %s550_s16 = scalar_lea.vmem %s549_s8, 64  ;;  %p551_p8 = scmp.lt.s32.totalorder %s168_s26, %s549_s8 }
  0x44   : > { %p546_p1 = pnand %p544_p9, %p500_p3  ;;  %p552_p11 = scmp.lt.s32.totalorder %s550_s16, %s543_s25 }
  0x46   : > { %p547_p6 = pneg %p546_p1  ;;  %p553_p2 = por %p552_p11, %p551_p8 }
  0x48   : > { %p554_p5 = pnand %p553_p2, %p547_p6 }
  0x4a   : > { %557 = shalt.err (!%p554_p5)
}
  0x4b   : > { %428 = dma.hbm_to_vmem [thread:$0]  (!%p745_p0), %s790_s19, 32, %s168_s26, %s156_s30  }
  0x4c   : > { %p898_p13 = scmp.ne.s32.totalorder %s897_s15, 0 }
  0x4d   : > { %s815_s18 = sand.u32 (!%p898_p13), 1, %s628_s10   ;;  %p899_p3 = scmp.ne.s32.totalorder (!%p898_p13), %s892_s21, 0 }
  0x4e   : > { %176 = sbr.rel (%p898_p13) target bundleno = 193 (0xc1), region = 28  ;;  %s407_s20 = sshll.u32 (!%p898_p13), %s815_s18, 3 }
  0x4f   : > { %s179_s4 = scalar_lea.sflag (!%p898_p13), [#allocation4], %s815_s18  ;;  %s182_s6 = scalar_lea.vmem (!%p898_p13), [#allocation3], %s407_s20 }
  0x55   : > { %611 = dma.done.wait (%p899_p3), %s179_s4, 128  }
  0x56   : > { %613 = vsyncadd (%p899_p3), %s179_s4, 4294967168  ;;  %s408_s5 = sshll.u32 %s815_s18, 1  ;;  %s188_s15 = scalar_lea.sflag [#allocation7], %s815_s18 }
  0x57   : > { %s825_s19 = scalar_lea.vmem [#allocation6], %s408_s5 }
  0x58   : > { %615 = dma.done.wait (%p899_p3), %s188_s15, 32  }
  0x59   : > { %617 = vsyncadd (%p899_p3), %s188_s15, 4294967264  ;;  %v650_v0 = vmov 0.0   ;;  %v222_v1 = vld [vmem:[%s182_s6] sm:$0x3]  ;;  %v409_v2 = vld [vmem:[%s182_s6 + $0x2] sm:$0x3] }
  0x5a   : > { %220 = vst [vmem:[#allocation2] sm:$0x3] %v650_v0  ;;  %v410_v3 = vld [vmem:[%s182_s6 + $0x4] sm:$0x3]  ;;  %v229_v4 = vmax.f32 %v222_v1, %v409_v2  ;;  %v411_v5 = vld [vmem:[%s182_s6 + $0x6] sm:$0x3] }
  0x5b   : > { %v221_v23 = vld [vmem:[%s825_s19] sm:$0x3]  ;;  %vm275_vm4 = vcmask 1041408   ;;  %s215_s21 = scalar_lea.vmem [#allocation8], %s815_s18  ;;  %s412_s30 = sshll.u32 %s636_s12, 4 }
  0x5c   : > { %v230_v6 = vmax.f32 %v229_v4, %v410_v3  ;;  %vm235_vm0 = vcmp.eq.s32.totalorder %v221_v23, 0  ;;  %vm241_vm1 = vcmp.eq.s32.totalorder %v221_v23, 1  ;;  %vm247_vm2 = vcmp.eq.s32.totalorder %v221_v23, 2  ;;  %s297_s26 = sshll.u32 %s215_s21, 4  ;;  %s839_s29 = scalar_lea.hbm %s888_s2, %s412_s30  ;;  %s834_s26 = int_to_ptr.vmem [resolvable:$true] %s297_s26 }
  0x5d   : > { %vm253_vm3 = vcmp.eq.s32.totalorder %v221_v23, 3  ;;  %s285_s3 = scalar_lea.sflag [#allocation5], %s815_s18  ;;  %s558_s25 = scalar_lea.vmem %s834_s26, 16 }
  0x5e   : > { %v231_v7 = vmax.f32 %v230_v6, %v411_v5  ;;  %p559_p8 = scmp.ne.s32.totalorder %s834_s26, %s558_s25  ;;  %p900_p0 = scmp.ne.s32.totalorder %s893_s22, 0 }
  0x5f   : > { %s651_s12 = smov [#allocation8]  }
  0x60   : > { %v232_v8 = vsub.f32 %v222_v1, %v231_v7  ;;  %v237_v9 = vsub.f32 %v409_v2, %v231_v7  ;;  %v243_v10 = vsub.f32 %v410_v3, %v231_v7  ;;  %v249_v11 = vsub.f32 %v411_v5, %v231_v7  ;;  %p560_p11 = pnand %p559_p8, %p900_p0  ;;  %s562_s7 = sshll.u32 %s651_s12, 4  ;;  %s563_s7 = int_to_ptr.vmem [resolvable:$false] %s562_s7 }
  0x61   : > { %v268_v40 = vld [vmem:[#allocation2] sm:$0x3]  ;;  %s564_s8 = scalar_lea.vmem %s563_s7, 32  ;;  %p565_p7 = scmp.lt.s32.totalorder %s834_s26, %s563_s7 }
  0x62   : > { %v233_v12 = vmul.f32 1.442695, %v232_v8  ;;  %v238_v13 = vmul.f32 1.442695, %v237_v9  ;;  %v244_v14 = vmul.f32 1.442695, %v243_v10  ;;  %p561_p4 = pneg %p560_p11  ;;  %p566_p10 = scmp.lt.s32.totalorder %s564_s8, %s558_s25 }
  0x63   : > { %v250_v15 = vmul.f32 1.442695, %v249_v11 }
  0x64   : > { %486 = vpow2.f32 %v233_v12  ;;  %p567_p12 = por %p566_p10, %p565_p7 }
  0x65   : > { %488 = vpow2.f32 %v238_v13 }
  0x66   : > { %490 = vpow2.f32 %v244_v14  ;;  %p568_p9 = pnand %p567_p12, %p561_p4 }
  0x67   : > { %492 = vpow2.f32 %v250_v15 }
  0x6e   : > { %v487_v16 = vpop.eup %486 }
  0x6f   : > { %v489_v17 = vpop.eup %488  ;;  %v236_v24 = vsel %vm235_vm0, %v487_v16, 0.0 }
  0x70   : > { %v491_v18 = vpop.eup %490  ;;  %v240_v19 = vadd.f32 %v489_v17, %v487_v16  ;;  %v242_v25 = vsel %vm241_vm1, %v489_v17, %v236_v24 }
  0x71   : > { %v493_v20 = vpop.eup %492  ;;  %v248_v27 = vsel %vm247_vm2, %v491_v18, %v242_v25 }
  0x72   : > { %v246_v21 = vadd.f32 %v491_v18, %v240_v19  ;;  %v254_v30 = vsel %vm253_vm3, %v493_v20, %v248_v27 }
  0x74   : > { %v252_v22 = vadd.f32 %v493_v20, %v246_v21 }
  0x76   : > { %494 = vrcp.f32 %v252_v22 }
  0x80   : > { %v495_v26 = vpop.eup %494 }
  0x81   : > { %v256_v28 = vmul.f32 %v495_v26, %v252_v22 }
  0x83   : > { %v257_v29 = vsub.f32 2.0, %v256_v28 }
  0x85   : > { %v258_v31 = vmul.f32 %v495_v26, %v257_v29 }
  0x87   : > { %v259_v32 = vmul.f32 %v258_v31, %v254_v30 }
  0x89   : > { %v260_v33 = vadd.f32 1e-10, %v259_v32 }
  0x8b   : > { %496 = vlog2.f32 %v260_v33  ;;  %v263_v34 = vsub.f32 1.0, %v260_v33 }
  0x8d   : > { %v264_v35 = vmax.f32 %v263_v34, 0.0 }
  0x8f   : > { %v265_v36 = vmul.f32 %v264_v35, %v264_v35 }
  0x95   : > { %v497_v37 = vpop.eup %496 }
  0x96   : > { %v262_v38 = vmul.f32 0.6931472, %v497_v37 }
  0x98   : > { %v266_v39 = vmul.f32 %v265_v36, %v262_v38 }
  0x9a   : > { %v267_v41 = vsub.f32 0.0, %v266_v39 }
  0x9c   : > { %v269_v42 = vadd.f32 %v268_v40, %v267_v41 }
  0x9e   : > { %270 = vst [vmem:[#allocation2] sm:$0x3] %v269_v42 }
  0xa5   : > { %v274_v43 = vld [vmem:[#allocation2] sm:$0x3] }
  0xa6   : > { %v276_v44 = vsel %vm275_vm4, %v274_v43, 0.0 }
  0xa7   : > { %v277_v45 = vrot.slane %v276_v44, 4 }
  0xa9   : > { %v278_v46 = vadd.f32 %v277_v45, %v276_v44 }
  0xab   : > { %v279_v47 = vrot.slane %v278_v46, 2 }
  0xad   : > { %v280_v48 = vadd.f32 %v279_v47, %v278_v46 }
  0xaf   : > { %v281_v49 = vrot.slane %v280_v48, 1 }
  0xb1   : > { %v282_v50 = vadd.f32 %v281_v49, %v280_v48 }
  0xb3   : > { %283 = vst [vmem:[%s215_s21] sm:$0x1] %v282_v50 }
  0xb4   : > { %571 = shalt.err (!%p568_p9)
}
  0xb5   : > { %s572_s16 = scalar_lea.hbm %s839_s29, 16  ;;  %s576_s4 = scalar_lea.hbm %s888_s2, 32 }
  0xb6   : > { %p573_p1 = scmp.ne.s32.totalorder %s839_s29, %s572_s16  ;;  %p577_p5 = scmp.lt.u32.totalorder %s839_s29, %s888_s2 }
  0xb7   : > { %p578_p13 = scmp.lt.u32.totalorder %s576_s4, %s572_s16  ;;  %p580_p8 = scmp.lt.u32.totalorder %s572_s16, %s839_s29 }
  0xb8   : > { %p574_p6 = pnand %p573_p1, %p900_p0 }
  0xb9   : > { %p579_p3 = por %p578_p13, %p577_p5 }
  0xba   : > { %p575_p2 = pneg %p574_p6 }
  0xbb   : > { %p581_p11 = por %p580_p8, %p579_p3 }
  0xbd   : > { %p582_p4 = pnand %p581_p11, %p575_p2 }
  0xbf   : > { %585 = shalt.err (!%p582_p4)
}
  0xc0   : > { %420 = dma.vmem_to_hbm [thread:$0]  (%p900_p0), %s834_s26, 16, %s839_s29, %s285_s3  }
  0xc1 PF: > { %s309_s15 = sand.u32 1, %s624_s9   ;;  %p901_p7 = scmp.ne.s32.totalorder %s894_s24, 0 }
  0xc2   : > { %p902_p10 = scmp.ge.s32.totalorder %s644_s14, 2  ;;  %s310_s19 = scalar_lea.sflag [#allocation5], %s309_s15 }
  0xc4   : > { %p430_p12 = pnand %p902_p10, %p901_p7 }
  0xc6   : > { %619 = dma.done.wait (!%p430_p12), %s310_s19, 16  }
  0xc7   : > { %621 = vsyncadd (!%p430_p12), %s310_s19, 4294967280  ;;  %s21_s14 = sadd.s32 1, %s644_s14   ;;  %s903_s9 = smov %s628_s10 }
  0xc8   : > { %p18_p9 = scmp.ge.s32.totalorder %s21_s14, 4   ;;  %s904_s10 = smov %s632_s11 }
  0xc9   : > { %s905_s11 = smov %s723_s23  ;;  %s906_s12 = smov %s640_s13 }
  0xca   : > { %s907_s13 = smov %s909_s17  ;;  %20 = sbr.rel (!%p18_p9) target bundleno = 8 (0x8), region = 97 }
  0xd1   :  { %314 = vsyncpa [#allocation4], 1 }
  0xd2   :  { %316 = vsyncpa [#allocation4 + $0x1], 1 }
  0xd3   :  { %317 = vsyncpa [#allocation7], 1 }
  0xd4   :  { %319 = vsyncpa [#allocation7 + $0x1], 1 }
  0xd5   :  { %320 = vsyncpa [#allocation5], 1 }
  0xd6   :  { %322 = vsyncpa [#allocation5 + $0x1], 1 }

</bundles_post_ra>
